<compile_context>
chip_gen: v5e
topology: v5e:2x2
jax: 0.10.0
libtpu: 0.0.40
codegen_flags: <defaults>
</compile_context>

<pallas_src>
import jax
import jax.numpy as jnp
from jax.experimental import pallas as pl
from jax.experimental.pallas import tpu as pltpu


def mlp_kernel(x_ref, w1_ref, b1_ref, w2_ref, b2_ref, w3_ref, b3_ref, o_ref):
    """Fused MLP on one batch tile.

    x_ref : (8, TILE_R, 128) f32 VMEM  -- feature-major, batch dense in (sub, lane).
    w*/b* : tiny f32 arrays in SMEM, read as scalars.
    o_ref : (TILE_R, 128) f32 VMEM.
    """

    def layer(rows, w_ref, b_ref, fan_in, fan_out):
        # rows: list of dense (TILE_R, 128) activation slabs, one per input feature.
        outs = []
        for i in range(fan_out):
            acc = rows[0] * w_ref[0, i] + b_ref[0, i]
            for j in range(1, fan_in):
                acc = acc + rows[j] * w_ref[j, i]
            outs.append(jax.nn.sigmoid(acc))
        return outs

    rows = [x_ref[j] for j in range(8)]          # 8 dense (TILE_R, 128) slabs
    h1 = layer(rows, w1_ref, b1_ref, 8, 6)
    h2 = layer(h1, w2_ref, b2_ref, 6, 4)
    h3 = layer(h2, w3_ref, b3_ref, 4, 1)
    o_ref[...] = h3[0]                           # full-width unmasked store


def mlp_forward(x, params, max_tile_rows=256):
    """x: (batch, 8) f32 -> (batch, 1) f32, same math as the PyTorch module."""
    w1, b1, w2, b2, w3, b3 = params
    n = x.shape[0]

    # Fold the batch into (rows, 128) lanes; rows are sublane-aligned (mult of 8)
    # and padded up to a multiple of the tile so every block is full-shape.
    rows = pl.cdiv(n, 128)
    rows8 = ((rows + 7) // 8) * 8
    tile_r = min(max_tile_rows, rows8)           # tile_r is a multiple of 8
    rows_pad = ((rows8 + tile_r - 1) // tile_r) * tile_r
    n_pad = rows_pad * 128

    x_t = jnp.pad(x.T.astype(jnp.float32), ((0, 0), (0, n_pad - n)))  # (8, n_pad)
    x3 = x_t.reshape(8, rows_pad, 128)                                # (8, rows, 128)

    smem = pl.BlockSpec(memory_space=pltpu.MemorySpace.SMEM)
    out = pl.pallas_call(
        mlp_kernel,
        out_shape=jax.ShapeDtypeStruct((rows_pad, 128), jnp.float32),
        grid=(rows_pad // tile_r,),
        in_specs=[
            pl.BlockSpec((8, tile_r, 128), lambda i: (0, i, 0)),  # streamed batch tiles
            smem, smem, smem, smem, smem, smem,                   # resident tiny params
        ],
        out_specs=pl.BlockSpec((tile_r, 128), lambda i: (i, 0)),
        compiler_params=pltpu.CompilerParams(
            dimension_semantics=("parallel",),                    # shard tiles across TCs
        ),
    )(x3, w1, b1, w2, b2, w3, b3)

    return out.reshape(n_pad, 1)[:n]


def init_params(key):
    # Deterministic init mimicking nn.Linear's U(-1/sqrt(fan_in), 1/sqrt(fan_in)).
    keys = jax.random.split(key, 6)

    def linear(kw, kb, fan_in, fan_out):
        bound = 1.0 / jnp.sqrt(float(fan_in))
        w = jax.random.uniform(kw, (fan_in, fan_out), jnp.float32, -bound, bound)
        b = jax.random.uniform(kb, (1, fan_out), jnp.float32, -bound, bound)
        return w, b

    w1, b1 = linear(keys[0], keys[1], 8, 6)
    w2, b2 = linear(keys[2], keys[3], 6, 4)
    w3, b3 = linear(keys[4], keys[5], 4, 1)
    return (w1, b1, w2, b2, w3, b3)


if __name__ == "__main__":
    key = jax.random.PRNGKey(0)
    kx, kp = jax.random.split(key)

    batch = 200                      # small, not a multiple of 128: exercises padding
    x = jax.random.normal(kx, (batch, 8), jnp.float32)
    params = init_params(kp)

    out = jax.block_until_ready(mlp_forward(x, params))

    # Plain-JAX reference (same math as the PyTorch module).
    w1, b1, w2, b2, w3, b3 = params
    ref = jax.nn.sigmoid(x @ w1 + b1)
    ref = jax.nn.sigmoid(ref @ w2 + b2)
    ref = jax.nn.sigmoid(ref @ w3 + b3)

    assert out.shape == (batch, 1), out.shape
    assert jnp.allclose(out, ref, atol=1e-5), "mismatch vs reference"
    print("KERNEL_OK")
</pallas_src>

<mosaic_0001>
module attributes {stable_mosaic.version = 11 : i64} {
  func.func @mlp_kernel(%arg0: i32, %arg1: memref<8x8x128xf32, #tpu.memory_space<vmem>>, %arg2: memref<8x6xf32, #tpu.memory_space<smem>>, %arg3: memref<1x6xf32, #tpu.memory_space<smem>>, %arg4: memref<6x4xf32, #tpu.memory_space<smem>>, %arg5: memref<1x4xf32, #tpu.memory_space<smem>>, %arg6: memref<4x1xf32, #tpu.memory_space<smem>>, %arg7: memref<1x1xf32, #tpu.memory_space<smem>>, %arg8: memref<8x128xf32, #tpu.memory_space<vmem>>) attributes {dimension_semantics = [#tpu.dimension_semantics<parallel>], iteration_bounds = array<i64: 1>, scalar_prefetch = 0 : i64, scratch_operands = 0 : i64, tpu.core_type = #tpu.core_type<tc>, window_params = [{transform_indices = @transform_0, window_bounds = array<i64: 8, 8, 128>}, {transform_indices = @transform_1, window_bounds = array<i64: 8, 6>}, {transform_indices = @transform_2, window_bounds = array<i64: 1, 6>}, {transform_indices = @transform_3, window_bounds = array<i64: 6, 4>}, {transform_indices = @transform_4, window_bounds = array<i64: 1, 4>}, {transform_indices = @transform_5, window_bounds = array<i64: 4, 1>}, {transform_indices = @transform_6, window_bounds = array<i64: 1, 1>}, {transform_indices = @transform_7, window_bounds = array<i64: 8, 128>}]} {
    %c0 = arith.constant 0 : index
    %c0_0 = arith.constant 0 : index
    %c0_1 = arith.constant 0 : index
    %0 = vector.load %arg1[%c0, %c0_0, %c0_1] : memref<8x8x128xf32, #tpu.memory_space<vmem>>, vector<1x8x128xf32>
    %1 = vector.shape_cast %0 : vector<1x8x128xf32> to vector<8x128xf32>
    %c1 = arith.constant 1 : index
    %c0_2 = arith.constant 0 : index
    %c0_3 = arith.constant 0 : index
    %2 = vector.load %arg1[%c1, %c0_2, %c0_3] : memref<8x8x128xf32, #tpu.memory_space<vmem>>, vector<1x8x128xf32>
    %3 = vector.shape_cast %2 : vector<1x8x128xf32> to vector<8x128xf32>
    %c2 = arith.constant 2 : index
    %c0_4 = arith.constant 0 : index
    %c0_5 = arith.constant 0 : index
    %4 = vector.load %arg1[%c2, %c0_4, %c0_5] : memref<8x8x128xf32, #tpu.memory_space<vmem>>, vector<1x8x128xf32>
    %5 = vector.shape_cast %4 : vector<1x8x128xf32> to vector<8x128xf32>
    %c3 = arith.constant 3 : index
    %c0_6 = arith.constant 0 : index
    %c0_7 = arith.constant 0 : index
    %6 = vector.load %arg1[%c3, %c0_6, %c0_7] : memref<8x8x128xf32, #tpu.memory_space<vmem>>, vector<1x8x128xf32>
    %7 = vector.shape_cast %6 : vector<1x8x128xf32> to vector<8x128xf32>
    %c4 = arith.constant 4 : index
    %c0_8 = arith.constant 0 : index
    %c0_9 = arith.constant 0 : index
    %8 = vector.load %arg1[%c4, %c0_8, %c0_9] : memref<8x8x128xf32, #tpu.memory_space<vmem>>, vector<1x8x128xf32>
    %9 = vector.shape_cast %8 : vector<1x8x128xf32> to vector<8x128xf32>
    %c5 = arith.constant 5 : index
    %c0_10 = arith.constant 0 : index
    %c0_11 = arith.constant 0 : index
    %10 = vector.load %arg1[%c5, %c0_10, %c0_11] : memref<8x8x128xf32, #tpu.memory_space<vmem>>, vector<1x8x128xf32>
    %11 = vector.shape_cast %10 : vector<1x8x128xf32> to vector<8x128xf32>
    %c6 = arith.constant 6 : index
    %c0_12 = arith.constant 0 : index
    %c0_13 = arith.constant 0 : index
    %12 = vector.load %arg1[%c6, %c0_12, %c0_13] : memref<8x8x128xf32, #tpu.memory_space<vmem>>, vector<1x8x128xf32>
    %13 = vector.shape_cast %12 : vector<1x8x128xf32> to vector<8x128xf32>
    %c7 = arith.constant 7 : index
    %c0_14 = arith.constant 0 : index
    %c0_15 = arith.constant 0 : index
    %14 = vector.load %arg1[%c7, %c0_14, %c0_15] : memref<8x8x128xf32, #tpu.memory_space<vmem>>, vector<1x8x128xf32>
    %15 = vector.shape_cast %14 : vector<1x8x128xf32> to vector<8x128xf32>
    %c0_16 = arith.constant 0 : index
    %c0_17 = arith.constant 0 : index
    %16 = memref.load %arg2[%c0_16, %c0_17] : memref<8x6xf32, #tpu.memory_space<smem>>
    %17 = vector.broadcast %16 : f32 to vector<8x128xf32>
    %18 = arith.mulf %1, %17 : vector<8x128xf32>
    %c0_18 = arith.constant 0 : index
    %c0_19 = arith.constant 0 : index
    %19 = memref.load %arg3[%c0_18, %c0_19] : memref<1x6xf32, #tpu.memory_space<smem>>
    %20 = vector.broadcast %19 : f32 to vector<8x128xf32>
    %21 = arith.addf %18, %20 : vector<8x128xf32>
    %c1_20 = arith.constant 1 : index
    %c0_21 = arith.constant 0 : index
    %22 = memref.load %arg2[%c1_20, %c0_21] : memref<8x6xf32, #tpu.memory_space<smem>>
    %23 = vector.broadcast %22 : f32 to vector<8x128xf32>
    %24 = arith.mulf %3, %23 : vector<8x128xf32>
    %25 = arith.addf %21, %24 : vector<8x128xf32>
    %c2_22 = arith.constant 2 : index
    %c0_23 = arith.constant 0 : index
    %26 = memref.load %arg2[%c2_22, %c0_23] : memref<8x6xf32, #tpu.memory_space<smem>>
    %27 = vector.broadcast %26 : f32 to vector<8x128xf32>
    %28 = arith.mulf %5, %27 : vector<8x128xf32>
    %29 = arith.addf %25, %28 : vector<8x128xf32>
    %c3_24 = arith.constant 3 : index
    %c0_25 = arith.constant 0 : index
    %30 = memref.load %arg2[%c3_24, %c0_25] : memref<8x6xf32, #tpu.memory_space<smem>>
    %31 = vector.broadcast %30 : f32 to vector<8x128xf32>
    %32 = arith.mulf %7, %31 : vector<8x128xf32>
    %33 = arith.addf %29, %32 : vector<8x128xf32>
    %c4_26 = arith.constant 4 : index
    %c0_27 = arith.constant 0 : index
    %34 = memref.load %arg2[%c4_26, %c0_27] : memref<8x6xf32, #tpu.memory_space<smem>>
    %35 = vector.broadcast %34 : f32 to vector<8x128xf32>
    %36 = arith.mulf %9, %35 : vector<8x128xf32>
    %37 = arith.addf %33, %36 : vector<8x128xf32>
    %c5_28 = arith.constant 5 : index
    %c0_29 = arith.constant 0 : index
    %38 = memref.load %arg2[%c5_28, %c0_29] : memref<8x6xf32, #tpu.memory_space<smem>>
    %39 = vector.broadcast %38 : f32 to vector<8x128xf32>
    %40 = arith.mulf %11, %39 : vector<8x128xf32>
    %41 = arith.addf %37, %40 : vector<8x128xf32>
    %c6_30 = arith.constant 6 : index
    %c0_31 = arith.constant 0 : index
    %42 = memref.load %arg2[%c6_30, %c0_31] : memref<8x6xf32, #tpu.memory_space<smem>>
    %43 = vector.broadcast %42 : f32 to vector<8x128xf32>
    %44 = arith.mulf %13, %43 : vector<8x128xf32>
    %45 = arith.addf %41, %44 : vector<8x128xf32>
    %c7_32 = arith.constant 7 : index
    %c0_33 = arith.constant 0 : index
    %46 = memref.load %arg2[%c7_32, %c0_33] : memref<8x6xf32, #tpu.memory_space<smem>>
    %47 = vector.broadcast %46 : f32 to vector<8x128xf32>
    %48 = arith.mulf %15, %47 : vector<8x128xf32>
    %49 = arith.addf %45, %48 : vector<8x128xf32>
    %50 = arith.negf %49 : vector<8x128xf32>
    %51 = math.exp %50 : vector<8x128xf32>
    %cst = arith.constant 1.000000e+00 : f32
    %52 = vector.broadcast %cst : f32 to vector<8x128xf32>
    %53 = arith.addf %52, %51 : vector<8x128xf32>
    %54 = arith.divf %52, %53 : vector<8x128xf32>
    %c0_34 = arith.constant 0 : index
    %c1_35 = arith.constant 1 : index
    %55 = memref.load %arg2[%c0_34, %c1_35] : memref<8x6xf32, #tpu.memory_space<smem>>
    %56 = vector.broadcast %55 : f32 to vector<8x128xf32>
    %57 = arith.mulf %1, %56 : vector<8x128xf32>
    %c0_36 = arith.constant 0 : index
    %c1_37 = arith.constant 1 : index
    %58 = memref.load %arg3[%c0_36, %c1_37] : memref<1x6xf32, #tpu.memory_space<smem>>
    %59 = vector.broadcast %58 : f32 to vector<8x128xf32>
    %60 = arith.addf %57, %59 : vector<8x128xf32>
    %c1_38 = arith.constant 1 : index
    %c1_39 = arith.constant 1 : index
    %61 = memref.load %arg2[%c1_38, %c1_39] : memref<8x6xf32, #tpu.memory_space<smem>>
    %62 = vector.broadcast %61 : f32 to vector<8x128xf32>
    %63 = arith.mulf %3, %62 : vector<8x128xf32>
    %64 = arith.addf %60, %63 : vector<8x128xf32>
    %c2_40 = arith.constant 2 : index
    %c1_41 = arith.constant 1 : index
    %65 = memref.load %arg2[%c2_40, %c1_41] : memref<8x6xf32, #tpu.memory_space<smem>>
    %66 = vector.broadcast %65 : f32 to vector<8x128xf32>
    %67 = arith.mulf %5, %66 : vector<8x128xf32>
    %68 = arith.addf %64, %67 : vector<8x128xf32>
    %c3_42 = arith.constant 3 : index
    %c1_43 = arith.constant 1 : index
    %69 = memref.load %arg2[%c3_42, %c1_43] : memref<8x6xf32, #tpu.memory_space<smem>>
    %70 = vector.broadcast %69 : f32 to vector<8x128xf32>
    %71 = arith.mulf %7, %70 : vector<8x128xf32>
    %72 = arith.addf %68, %71 : vector<8x128xf32>
    %c4_44 = arith.constant 4 : index
    %c1_45 = arith.constant 1 : index
    %73 = memref.load %arg2[%c4_44, %c1_45] : memref<8x6xf32, #tpu.memory_space<smem>>
    %74 = vector.broadcast %73 : f32 to vector<8x128xf32>
    %75 = arith.mulf %9, %74 : vector<8x128xf32>
    %76 = arith.addf %72, %75 : vector<8x128xf32>
    %c5_46 = arith.constant 5 : index
    %c1_47 = arith.constant 1 : index
    %77 = memref.load %arg2[%c5_46, %c1_47] : memref<8x6xf32, #tpu.memory_space<smem>>
    %78 = vector.broadcast %77 : f32 to vector<8x128xf32>
    %79 = arith.mulf %11, %78 : vector<8x128xf32>
    %80 = arith.addf %76, %79 : vector<8x128xf32>
    %c6_48 = arith.constant 6 : index
    %c1_49 = arith.constant 1 : index
    %81 = memref.load %arg2[%c6_48, %c1_49] : memref<8x6xf32, #tpu.memory_space<smem>>
    %82 = vector.broadcast %81 : f32 to vector<8x128xf32>
    %83 = arith.mulf %13, %82 : vector<8x128xf32>
    %84 = arith.addf %80, %83 : vector<8x128xf32>
    %c7_50 = arith.constant 7 : index
    %c1_51 = arith.constant 1 : index
    %85 = memref.load %arg2[%c7_50, %c1_51] : memref<8x6xf32, #tpu.memory_space<smem>>
    %86 = vector.broadcast %85 : f32 to vector<8x128xf32>
    %87 = arith.mulf %15, %86 : vector<8x128xf32>
    %88 = arith.addf %84, %87 : vector<8x128xf32>
    %89 = arith.negf %88 : vector<8x128xf32>
    %90 = math.exp %89 : vector<8x128xf32>
    %cst_52 = arith.constant 1.000000e+00 : f32
    %91 = vector.broadcast %cst_52 : f32 to vector<8x128xf32>
    %92 = arith.addf %91, %90 : vector<8x128xf32>
    %93 = arith.divf %91, %92 : vector<8x128xf32>
    %c0_53 = arith.constant 0 : index
    %c2_54 = arith.constant 2 : index
    %94 = memref.load %arg2[%c0_53, %c2_54] : memref<8x6xf32, #tpu.memory_space<smem>>
    %95 = vector.broadcast %94 : f32 to vector<8x128xf32>
    %96 = arith.mulf %1, %95 : vector<8x128xf32>
    %c0_55 = arith.constant 0 : index
    %c2_56 = arith.constant 2 : index
    %97 = memref.load %arg3[%c0_55, %c2_56] : memref<1x6xf32, #tpu.memory_space<smem>>
    %98 = vector.broadcast %97 : f32 to vector<8x128xf32>
    %99 = arith.addf %96, %98 : vector<8x128xf32>
    %c1_57 = arith.constant 1 : index
    %c2_58 = arith.constant 2 : index
    %100 = memref.load %arg2[%c1_57, %c2_58] : memref<8x6xf32, #tpu.memory_space<smem>>
    %101 = vector.broadcast %100 : f32 to vector<8x128xf32>
    %102 = arith.mulf %3, %101 : vector<8x128xf32>
    %103 = arith.addf %99, %102 : vector<8x128xf32>
    %c2_59 = arith.constant 2 : index
    %c2_60 = arith.constant 2 : index
    %104 = memref.load %arg2[%c2_59, %c2_60] : memref<8x6xf32, #tpu.memory_space<smem>>
    %105 = vector.broadcast %104 : f32 to vector<8x128xf32>
    %106 = arith.mulf %5, %105 : vector<8x128xf32>
    %107 = arith.addf %103, %106 : vector<8x128xf32>
    %c3_61 = arith.constant 3 : index
    %c2_62 = arith.constant 2 : index
    %108 = memref.load %arg2[%c3_61, %c2_62] : memref<8x6xf32, #tpu.memory_space<smem>>
    %109 = vector.broadcast %108 : f32 to vector<8x128xf32>
    %110 = arith.mulf %7, %109 : vector<8x128xf32>
    %111 = arith.addf %107, %110 : vector<8x128xf32>
    %c4_63 = arith.constant 4 : index
    %c2_64 = arith.constant 2 : index
    %112 = memref.load %arg2[%c4_63, %c2_64] : memref<8x6xf32, #tpu.memory_space<smem>>
    %113 = vector.broadcast %112 : f32 to vector<8x128xf32>
    %114 = arith.mulf %9, %113 : vector<8x128xf32>
    %115 = arith.addf %111, %114 : vector<8x128xf32>
    %c5_65 = arith.constant 5 : index
    %c2_66 = arith.constant 2 : index
    %116 = memref.load %arg2[%c5_65, %c2_66] : memref<8x6xf32, #tpu.memory_space<smem>>
    %117 = vector.broadcast %116 : f32 to vector<8x128xf32>
    %118 = arith.mulf %11, %117 : vector<8x128xf32>
    %119 = arith.addf %115, %118 : vector<8x128xf32>
    %c6_67 = arith.constant 6 : index
    %c2_68 = arith.constant 2 : index
    %120 = memref.load %arg2[%c6_67, %c2_68] : memref<8x6xf32, #tpu.memory_space<smem>>
    %121 = vector.broadcast %120 : f32 to vector<8x128xf32>
    %122 = arith.mulf %13, %121 : vector<8x128xf32>
    %123 = arith.addf %119, %122 : vector<8x128xf32>
    %c7_69 = arith.constant 7 : index
    %c2_70 = arith.constant 2 : index
    %124 = memref.load %arg2[%c7_69, %c2_70] : memref<8x6xf32, #tpu.memory_space<smem>>
    %125 = vector.broadcast %124 : f32 to vector<8x128xf32>
    %126 = arith.mulf %15, %125 : vector<8x128xf32>
    %127 = arith.addf %123, %126 : vector<8x128xf32>
    %128 = arith.negf %127 : vector<8x128xf32>
    %129 = math.exp %128 : vector<8x128xf32>
    %cst_71 = arith.constant 1.000000e+00 : f32
    %130 = vector.broadcast %cst_71 : f32 to vector<8x128xf32>
    %131 = arith.addf %130, %129 : vector<8x128xf32>
    %132 = arith.divf %130, %131 : vector<8x128xf32>
    %c0_72 = arith.constant 0 : index
    %c3_73 = arith.constant 3 : index
    %133 = memref.load %arg2[%c0_72, %c3_73] : memref<8x6xf32, #tpu.memory_space<smem>>
    %134 = vector.broadcast %133 : f32 to vector<8x128xf32>
    %135 = arith.mulf %1, %134 : vector<8x128xf32>
    %c0_74 = arith.constant 0 : index
    %c3_75 = arith.constant 3 : index
    %136 = memref.load %arg3[%c0_74, %c3_75] : memref<1x6xf32, #tpu.memory_space<smem>>
    %137 = vector.broadcast %136 : f32 to vector<8x128xf32>
    %138 = arith.addf %135, %137 : vector<8x128xf32>
    %c1_76 = arith.constant 1 : index
    %c3_77 = arith.constant 3 : index
    %139 = memref.load %arg2[%c1_76, %c3_77] : memref<8x6xf32, #tpu.memory_space<smem>>
    %140 = vector.broadcast %139 : f32 to vector<8x128xf32>
    %141 = arith.mulf %3, %140 : vector<8x128xf32>
    %142 = arith.addf %138, %141 : vector<8x128xf32>
    %c2_78 = arith.constant 2 : index
    %c3_79 = arith.constant 3 : index
    %143 = memref.load %arg2[%c2_78, %c3_79] : memref<8x6xf32, #tpu.memory_space<smem>>
    %144 = vector.broadcast %143 : f32 to vector<8x128xf32>
    %145 = arith.mulf %5, %144 : vector<8x128xf32>
    %146 = arith.addf %142, %145 : vector<8x128xf32>
    %c3_80 = arith.constant 3 : index
    %c3_81 = arith.constant 3 : index
    %147 = memref.load %arg2[%c3_80, %c3_81] : memref<8x6xf32, #tpu.memory_space<smem>>
    %148 = vector.broadcast %147 : f32 to vector<8x128xf32>
    %149 = arith.mulf %7, %148 : vector<8x128xf32>
    %150 = arith.addf %146, %149 : vector<8x128xf32>
    %c4_82 = arith.constant 4 : index
    %c3_83 = arith.constant 3 : index
    %151 = memref.load %arg2[%c4_82, %c3_83] : memref<8x6xf32, #tpu.memory_space<smem>>
    %152 = vector.broadcast %151 : f32 to vector<8x128xf32>
    %153 = arith.mulf %9, %152 : vector<8x128xf32>
    %154 = arith.addf %150, %153 : vector<8x128xf32>
    %c5_84 = arith.constant 5 : index
    %c3_85 = arith.constant 3 : index
    %155 = memref.load %arg2[%c5_84, %c3_85] : memref<8x6xf32, #tpu.memory_space<smem>>
    %156 = vector.broadcast %155 : f32 to vector<8x128xf32>
    %157 = arith.mulf %11, %156 : vector<8x128xf32>
    %158 = arith.addf %154, %157 : vector<8x128xf32>
    %c6_86 = arith.constant 6 : index
    %c3_87 = arith.constant 3 : index
    %159 = memref.load %arg2[%c6_86, %c3_87] : memref<8x6xf32, #tpu.memory_space<smem>>
    %160 = vector.broadcast %159 : f32 to vector<8x128xf32>
    %161 = arith.mulf %13, %160 : vector<8x128xf32>
    %162 = arith.addf %158, %161 : vector<8x128xf32>
    %c7_88 = arith.constant 7 : index
    %c3_89 = arith.constant 3 : index
    %163 = memref.load %arg2[%c7_88, %c3_89] : memref<8x6xf32, #tpu.memory_space<smem>>
    %164 = vector.broadcast %163 : f32 to vector<8x128xf32>
    %165 = arith.mulf %15, %164 : vector<8x128xf32>
    %166 = arith.addf %162, %165 : vector<8x128xf32>
    %167 = arith.negf %166 : vector<8x128xf32>
    %168 = math.exp %167 : vector<8x128xf32>
    %cst_90 = arith.constant 1.000000e+00 : f32
    %169 = vector.broadcast %cst_90 : f32 to vector<8x128xf32>
    %170 = arith.addf %169, %168 : vector<8x128xf32>
    %171 = arith.divf %169, %170 : vector<8x128xf32>
    %c0_91 = arith.constant 0 : index
    %c4_92 = arith.constant 4 : index
    %172 = memref.load %arg2[%c0_91, %c4_92] : memref<8x6xf32, #tpu.memory_space<smem>>
    %173 = vector.broadcast %172 : f32 to vector<8x128xf32>
    %174 = arith.mulf %1, %173 : vector<8x128xf32>
    %c0_93 = arith.constant 0 : index
    %c4_94 = arith.constant 4 : index
    %175 = memref.load %arg3[%c0_93, %c4_94] : memref<1x6xf32, #tpu.memory_space<smem>>
    %176 = vector.broadcast %175 : f32 to vector<8x128xf32>
    %177 = arith.addf %174, %176 : vector<8x128xf32>
    %c1_95 = arith.constant 1 : index
    %c4_96 = arith.constant 4 : index
    %178 = memref.load %arg2[%c1_95, %c4_96] : memref<8x6xf32, #tpu.memory_space<smem>>
    %179 = vector.broadcast %178 : f32 to vector<8x128xf32>
    %180 = arith.mulf %3, %179 : vector<8x128xf32>
    %181 = arith.addf %177, %180 : vector<8x128xf32>
    %c2_97 = arith.constant 2 : index
    %c4_98 = arith.constant 4 : index
    %182 = memref.load %arg2[%c2_97, %c4_98] : memref<8x6xf32, #tpu.memory_space<smem>>
    %183 = vector.broadcast %182 : f32 to vector<8x128xf32>
    %184 = arith.mulf %5, %183 : vector<8x128xf32>
    %185 = arith.addf %181, %184 : vector<8x128xf32>
    %c3_99 = arith.constant 3 : index
    %c4_100 = arith.constant 4 : index
    %186 = memref.load %arg2[%c3_99, %c4_100] : memref<8x6xf32, #tpu.memory_space<smem>>
    %187 = vector.broadcast %186 : f32 to vector<8x128xf32>
    %188 = arith.mulf %7, %187 : vector<8x128xf32>
    %189 = arith.addf %185, %188 : vector<8x128xf32>
    %c4_101 = arith.constant 4 : index
    %c4_102 = arith.constant 4 : index
    %190 = memref.load %arg2[%c4_101, %c4_102] : memref<8x6xf32, #tpu.memory_space<smem>>
    %191 = vector.broadcast %190 : f32 to vector<8x128xf32>
    %192 = arith.mulf %9, %191 : vector<8x128xf32>
    %193 = arith.addf %189, %192 : vector<8x128xf32>
    %c5_103 = arith.constant 5 : index
    %c4_104 = arith.constant 4 : index
    %194 = memref.load %arg2[%c5_103, %c4_104] : memref<8x6xf32, #tpu.memory_space<smem>>
    %195 = vector.broadcast %194 : f32 to vector<8x128xf32>
    %196 = arith.mulf %11, %195 : vector<8x128xf32>
    %197 = arith.addf %193, %196 : vector<8x128xf32>
    %c6_105 = arith.constant 6 : index
    %c4_106 = arith.constant 4 : index
    %198 = memref.load %arg2[%c6_105, %c4_106] : memref<8x6xf32, #tpu.memory_space<smem>>
    %199 = vector.broadcast %198 : f32 to vector<8x128xf32>
    %200 = arith.mulf %13, %199 : vector<8x128xf32>
    %201 = arith.addf %197, %200 : vector<8x128xf32>
    %c7_107 = arith.constant 7 : index
    %c4_108 = arith.constant 4 : index
    %202 = memref.load %arg2[%c7_107, %c4_108] : memref<8x6xf32, #tpu.memory_space<smem>>
    %203 = vector.broadcast %202 : f32 to vector<8x128xf32>
    %204 = arith.mulf %15, %203 : vector<8x128xf32>
    %205 = arith.addf %201, %204 : vector<8x128xf32>
    %206 = arith.negf %205 : vector<8x128xf32>
    %207 = math.exp %206 : vector<8x128xf32>
    %cst_109 = arith.constant 1.000000e+00 : f32
    %208 = vector.broadcast %cst_109 : f32 to vector<8x128xf32>
    %209 = arith.addf %208, %207 : vector<8x128xf32>
    %210 = arith.divf %208, %209 : vector<8x128xf32>
    %c0_110 = arith.constant 0 : index
    %c5_111 = arith.constant 5 : index
    %211 = memref.load %arg2[%c0_110, %c5_111] : memref<8x6xf32, #tpu.memory_space<smem>>
    %212 = vector.broadcast %211 : f32 to vector<8x128xf32>
    %213 = arith.mulf %1, %212 : vector<8x128xf32>
    %c0_112 = arith.constant 0 : index
    %c5_113 = arith.constant 5 : index
    %214 = memref.load %arg3[%c0_112, %c5_113] : memref<1x6xf32, #tpu.memory_space<smem>>
    %215 = vector.broadcast %214 : f32 to vector<8x128xf32>
    %216 = arith.addf %213, %215 : vector<8x128xf32>
    %c1_114 = arith.constant 1 : index
    %c5_115 = arith.constant 5 : index
    %217 = memref.load %arg2[%c1_114, %c5_115] : memref<8x6xf32, #tpu.memory_space<smem>>
    %218 = vector.broadcast %217 : f32 to vector<8x128xf32>
    %219 = arith.mulf %3, %218 : vector<8x128xf32>
    %220 = arith.addf %216, %219 : vector<8x128xf32>
    %c2_116 = arith.constant 2 : index
    %c5_117 = arith.constant 5 : index
    %221 = memref.load %arg2[%c2_116, %c5_117] : memref<8x6xf32, #tpu.memory_space<smem>>
    %222 = vector.broadcast %221 : f32 to vector<8x128xf32>
    %223 = arith.mulf %5, %222 : vector<8x128xf32>
    %224 = arith.addf %220, %223 : vector<8x128xf32>
    %c3_118 = arith.constant 3 : index
    %c5_119 = arith.constant 5 : index
    %225 = memref.load %arg2[%c3_118, %c5_119] : memref<8x6xf32, #tpu.memory_space<smem>>
    %226 = vector.broadcast %225 : f32 to vector<8x128xf32>
    %227 = arith.mulf %7, %226 : vector<8x128xf32>
    %228 = arith.addf %224, %227 : vector<8x128xf32>
    %c4_120 = arith.constant 4 : index
    %c5_121 = arith.constant 5 : index
    %229 = memref.load %arg2[%c4_120, %c5_121] : memref<8x6xf32, #tpu.memory_space<smem>>
    %230 = vector.broadcast %229 : f32 to vector<8x128xf32>
    %231 = arith.mulf %9, %230 : vector<8x128xf32>
    %232 = arith.addf %228, %231 : vector<8x128xf32>
    %c5_122 = arith.constant 5 : index
    %c5_123 = arith.constant 5 : index
    %233 = memref.load %arg2[%c5_122, %c5_123] : memref<8x6xf32, #tpu.memory_space<smem>>
    %234 = vector.broadcast %233 : f32 to vector<8x128xf32>
    %235 = arith.mulf %11, %234 : vector<8x128xf32>
    %236 = arith.addf %232, %235 : vector<8x128xf32>
    %c6_124 = arith.constant 6 : index
    %c5_125 = arith.constant 5 : index
    %237 = memref.load %arg2[%c6_124, %c5_125] : memref<8x6xf32, #tpu.memory_space<smem>>
    %238 = vector.broadcast %237 : f32 to vector<8x128xf32>
    %239 = arith.mulf %13, %238 : vector<8x128xf32>
    %240 = arith.addf %236, %239 : vector<8x128xf32>
    %c7_126 = arith.constant 7 : index
    %c5_127 = arith.constant 5 : index
    %241 = memref.load %arg2[%c7_126, %c5_127] : memref<8x6xf32, #tpu.memory_space<smem>>
    %242 = vector.broadcast %241 : f32 to vector<8x128xf32>
    %243 = arith.mulf %15, %242 : vector<8x128xf32>
    %244 = arith.addf %240, %243 : vector<8x128xf32>
    %245 = arith.negf %244 : vector<8x128xf32>
    %246 = math.exp %245 : vector<8x128xf32>
    %cst_128 = arith.constant 1.000000e+00 : f32
    %247 = vector.broadcast %cst_128 : f32 to vector<8x128xf32>
    %248 = arith.addf %247, %246 : vector<8x128xf32>
    %249 = arith.divf %247, %248 : vector<8x128xf32>
    %c0_129 = arith.constant 0 : index
    %c0_130 = arith.constant 0 : index
    %250 = memref.load %arg4[%c0_129, %c0_130] : memref<6x4xf32, #tpu.memory_space<smem>>
    %251 = vector.broadcast %250 : f32 to vector<8x128xf32>
    %252 = arith.mulf %54, %251 : vector<8x128xf32>
    %c0_131 = arith.constant 0 : index
    %c0_132 = arith.constant 0 : index
    %253 = memref.load %arg5[%c0_131, %c0_132] : memref<1x4xf32, #tpu.memory_space<smem>>
    %254 = vector.broadcast %253 : f32 to vector<8x128xf32>
    %255 = arith.addf %252, %254 : vector<8x128xf32>
    %c1_133 = arith.constant 1 : index
    %c0_134 = arith.constant 0 : index
    %256 = memref.load %arg4[%c1_133, %c0_134] : memref<6x4xf32, #tpu.memory_space<smem>>
    %257 = vector.broadcast %256 : f32 to vector<8x128xf32>
    %258 = arith.mulf %93, %257 : vector<8x128xf32>
    %259 = arith.addf %255, %258 : vector<8x128xf32>
    %c2_135 = arith.constant 2 : index
    %c0_136 = arith.constant 0 : index
    %260 = memref.load %arg4[%c2_135, %c0_136] : memref<6x4xf32, #tpu.memory_space<smem>>
    %261 = vector.broadcast %260 : f32 to vector<8x128xf32>
    %262 = arith.mulf %132, %261 : vector<8x128xf32>
    %263 = arith.addf %259, %262 : vector<8x128xf32>
    %c3_137 = arith.constant 3 : index
    %c0_138 = arith.constant 0 : index
    %264 = memref.load %arg4[%c3_137, %c0_138] : memref<6x4xf32, #tpu.memory_space<smem>>
    %265 = vector.broadcast %264 : f32 to vector<8x128xf32>
    %266 = arith.mulf %171, %265 : vector<8x128xf32>
    %267 = arith.addf %263, %266 : vector<8x128xf32>
    %c4_139 = arith.constant 4 : index
    %c0_140 = arith.constant 0 : index
    %268 = memref.load %arg4[%c4_139, %c0_140] : memref<6x4xf32, #tpu.memory_space<smem>>
    %269 = vector.broadcast %268 : f32 to vector<8x128xf32>
    %270 = arith.mulf %210, %269 : vector<8x128xf32>
    %271 = arith.addf %267, %270 : vector<8x128xf32>
    %c5_141 = arith.constant 5 : index
    %c0_142 = arith.constant 0 : index
    %272 = memref.load %arg4[%c5_141, %c0_142] : memref<6x4xf32, #tpu.memory_space<smem>>
    %273 = vector.broadcast %272 : f32 to vector<8x128xf32>
    %274 = arith.mulf %249, %273 : vector<8x128xf32>
    %275 = arith.addf %271, %274 : vector<8x128xf32>
    %276 = arith.negf %275 : vector<8x128xf32>
    %277 = math.exp %276 : vector<8x128xf32>
    %cst_143 = arith.constant 1.000000e+00 : f32
    %278 = vector.broadcast %cst_143 : f32 to vector<8x128xf32>
    %279 = arith.addf %278, %277 : vector<8x128xf32>
    %280 = arith.divf %278, %279 : vector<8x128xf32>
    %c0_144 = arith.constant 0 : index
    %c1_145 = arith.constant 1 : index
    %281 = memref.load %arg4[%c0_144, %c1_145] : memref<6x4xf32, #tpu.memory_space<smem>>
    %282 = vector.broadcast %281 : f32 to vector<8x128xf32>
    %283 = arith.mulf %54, %282 : vector<8x128xf32>
    %c0_146 = arith.constant 0 : index
    %c1_147 = arith.constant 1 : index
    %284 = memref.load %arg5[%c0_146, %c1_147] : memref<1x4xf32, #tpu.memory_space<smem>>
    %285 = vector.broadcast %284 : f32 to vector<8x128xf32>
    %286 = arith.addf %283, %285 : vector<8x128xf32>
    %c1_148 = arith.constant 1 : index
    %c1_149 = arith.constant 1 : index
    %287 = memref.load %arg4[%c1_148, %c1_149] : memref<6x4xf32, #tpu.memory_space<smem>>
    %288 = vector.broadcast %287 : f32 to vector<8x128xf32>
    %289 = arith.mulf %93, %288 : vector<8x128xf32>
    %290 = arith.addf %286, %289 : vector<8x128xf32>
    %c2_150 = arith.constant 2 : index
    %c1_151 = arith.constant 1 : index
    %291 = memref.load %arg4[%c2_150, %c1_151] : memref<6x4xf32, #tpu.memory_space<smem>>
    %292 = vector.broadcast %291 : f32 to vector<8x128xf32>
    %293 = arith.mulf %132, %292 : vector<8x128xf32>
    %294 = arith.addf %290, %293 : vector<8x128xf32>
    %c3_152 = arith.constant 3 : index
    %c1_153 = arith.constant 1 : index
    %295 = memref.load %arg4[%c3_152, %c1_153] : memref<6x4xf32, #tpu.memory_space<smem>>
    %296 = vector.broadcast %295 : f32 to vector<8x128xf32>
    %297 = arith.mulf %171, %296 : vector<8x128xf32>
    %298 = arith.addf %294, %297 : vector<8x128xf32>
    %c4_154 = arith.constant 4 : index
    %c1_155 = arith.constant 1 : index
    %299 = memref.load %arg4[%c4_154, %c1_155] : memref<6x4xf32, #tpu.memory_space<smem>>
    %300 = vector.broadcast %299 : f32 to vector<8x128xf32>
    %301 = arith.mulf %210, %300 : vector<8x128xf32>
    %302 = arith.addf %298, %301 : vector<8x128xf32>
    %c5_156 = arith.constant 5 : index
    %c1_157 = arith.constant 1 : index
    %303 = memref.load %arg4[%c5_156, %c1_157] : memref<6x4xf32, #tpu.memory_space<smem>>
    %304 = vector.broadcast %303 : f32 to vector<8x128xf32>
    %305 = arith.mulf %249, %304 : vector<8x128xf32>
    %306 = arith.addf %302, %305 : vector<8x128xf32>
    %307 = arith.negf %306 : vector<8x128xf32>
    %308 = math.exp %307 : vector<8x128xf32>
    %cst_158 = arith.constant 1.000000e+00 : f32
    %309 = vector.broadcast %cst_158 : f32 to vector<8x128xf32>
    %310 = arith.addf %309, %308 : vector<8x128xf32>
    %311 = arith.divf %309, %310 : vector<8x128xf32>
    %c0_159 = arith.constant 0 : index
    %c2_160 = arith.constant 2 : index
    %312 = memref.load %arg4[%c0_159, %c2_160] : memref<6x4xf32, #tpu.memory_space<smem>>
    %313 = vector.broadcast %312 : f32 to vector<8x128xf32>
    %314 = arith.mulf %54, %313 : vector<8x128xf32>
    %c0_161 = arith.constant 0 : index
    %c2_162 = arith.constant 2 : index
    %315 = memref.load %arg5[%c0_161, %c2_162] : memref<1x4xf32, #tpu.memory_space<smem>>
    %316 = vector.broadcast %315 : f32 to vector<8x128xf32>
    %317 = arith.addf %314, %316 : vector<8x128xf32>
    %c1_163 = arith.constant 1 : index
    %c2_164 = arith.constant 2 : index
    %318 = memref.load %arg4[%c1_163, %c2_164] : memref<6x4xf32, #tpu.memory_space<smem>>
    %319 = vector.broadcast %318 : f32 to vector<8x128xf32>
    %320 = arith.mulf %93, %319 : vector<8x128xf32>
    %321 = arith.addf %317, %320 : vector<8x128xf32>
    %c2_165 = arith.constant 2 : index
    %c2_166 = arith.constant 2 : index
    %322 = memref.load %arg4[%c2_165, %c2_166] : memref<6x4xf32, #tpu.memory_space<smem>>
    %323 = vector.broadcast %322 : f32 to vector<8x128xf32>
    %324 = arith.mulf %132, %323 : vector<8x128xf32>
    %325 = arith.addf %321, %324 : vector<8x128xf32>
    %c3_167 = arith.constant 3 : index
    %c2_168 = arith.constant 2 : index
    %326 = memref.load %arg4[%c3_167, %c2_168] : memref<6x4xf32, #tpu.memory_space<smem>>
    %327 = vector.broadcast %326 : f32 to vector<8x128xf32>
    %328 = arith.mulf %171, %327 : vector<8x128xf32>
    %329 = arith.addf %325, %328 : vector<8x128xf32>
    %c4_169 = arith.constant 4 : index
    %c2_170 = arith.constant 2 : index
    %330 = memref.load %arg4[%c4_169, %c2_170] : memref<6x4xf32, #tpu.memory_space<smem>>
    %331 = vector.broadcast %330 : f32 to vector<8x128xf32>
    %332 = arith.mulf %210, %331 : vector<8x128xf32>
    %333 = arith.addf %329, %332 : vector<8x128xf32>
    %c5_171 = arith.constant 5 : index
    %c2_172 = arith.constant 2 : index
    %334 = memref.load %arg4[%c5_171, %c2_172] : memref<6x4xf32, #tpu.memory_space<smem>>
    %335 = vector.broadcast %334 : f32 to vector<8x128xf32>
    %336 = arith.mulf %249, %335 : vector<8x128xf32>
    %337 = arith.addf %333, %336 : vector<8x128xf32>
    %338 = arith.negf %337 : vector<8x128xf32>
    %339 = math.exp %338 : vector<8x128xf32>
    %cst_173 = arith.constant 1.000000e+00 : f32
    %340 = vector.broadcast %cst_173 : f32 to vector<8x128xf32>
    %341 = arith.addf %340, %339 : vector<8x128xf32>
    %342 = arith.divf %340, %341 : vector<8x128xf32>
    %c0_174 = arith.constant 0 : index
    %c3_175 = arith.constant 3 : index
    %343 = memref.load %arg4[%c0_174, %c3_175] : memref<6x4xf32, #tpu.memory_space<smem>>
    %344 = vector.broadcast %343 : f32 to vector<8x128xf32>
    %345 = arith.mulf %54, %344 : vector<8x128xf32>
    %c0_176 = arith.constant 0 : index
    %c3_177 = arith.constant 3 : index
    %346 = memref.load %arg5[%c0_176, %c3_177] : memref<1x4xf32, #tpu.memory_space<smem>>
    %347 = vector.broadcast %346 : f32 to vector<8x128xf32>
    %348 = arith.addf %345, %347 : vector<8x128xf32>
    %c1_178 = arith.constant 1 : index
    %c3_179 = arith.constant 3 : index
    %349 = memref.load %arg4[%c1_178, %c3_179] : memref<6x4xf32, #tpu.memory_space<smem>>
    %350 = vector.broadcast %349 : f32 to vector<8x128xf32>
    %351 = arith.mulf %93, %350 : vector<8x128xf32>
    %352 = arith.addf %348, %351 : vector<8x128xf32>
    %c2_180 = arith.constant 2 : index
    %c3_181 = arith.constant 3 : index
    %353 = memref.load %arg4[%c2_180, %c3_181] : memref<6x4xf32, #tpu.memory_space<smem>>
    %354 = vector.broadcast %353 : f32 to vector<8x128xf32>
    %355 = arith.mulf %132, %354 : vector<8x128xf32>
    %356 = arith.addf %352, %355 : vector<8x128xf32>
    %c3_182 = arith.constant 3 : index
    %c3_183 = arith.constant 3 : index
    %357 = memref.load %arg4[%c3_182, %c3_183] : memref<6x4xf32, #tpu.memory_space<smem>>
    %358 = vector.broadcast %357 : f32 to vector<8x128xf32>
    %359 = arith.mulf %171, %358 : vector<8x128xf32>
    %360 = arith.addf %356, %359 : vector<8x128xf32>
    %c4_184 = arith.constant 4 : index
    %c3_185 = arith.constant 3 : index
    %361 = memref.load %arg4[%c4_184, %c3_185] : memref<6x4xf32, #tpu.memory_space<smem>>
    %362 = vector.broadcast %361 : f32 to vector<8x128xf32>
    %363 = arith.mulf %210, %362 : vector<8x128xf32>
    %364 = arith.addf %360, %363 : vector<8x128xf32>
    %c5_186 = arith.constant 5 : index
    %c3_187 = arith.constant 3 : index
    %365 = memref.load %arg4[%c5_186, %c3_187] : memref<6x4xf32, #tpu.memory_space<smem>>
    %366 = vector.broadcast %365 : f32 to vector<8x128xf32>
    %367 = arith.mulf %249, %366 : vector<8x128xf32>
    %368 = arith.addf %364, %367 : vector<8x128xf32>
    %369 = arith.negf %368 : vector<8x128xf32>
    %370 = math.exp %369 : vector<8x128xf32>
    %cst_188 = arith.constant 1.000000e+00 : f32
    %371 = vector.broadcast %cst_188 : f32 to vector<8x128xf32>
    %372 = arith.addf %371, %370 : vector<8x128xf32>
    %373 = arith.divf %371, %372 : vector<8x128xf32>
    %c0_189 = arith.constant 0 : index
    %c0_190 = arith.constant 0 : index
    %374 = memref.load %arg6[%c0_189, %c0_190] : memref<4x1xf32, #tpu.memory_space<smem>>
    %375 = vector.broadcast %374 : f32 to vector<8x128xf32>
    %376 = arith.mulf %280, %375 : vector<8x128xf32>
    %c0_191 = arith.constant 0 : index
    %c0_192 = arith.constant 0 : index
    %377 = memref.load %arg7[%c0_191, %c0_192] : memref<1x1xf32, #tpu.memory_space<smem>>
    %378 = vector.broadcast %377 : f32 to vector<8x128xf32>
    %379 = arith.addf %376, %378 : vector<8x128xf32>
    %c1_193 = arith.constant 1 : index
    %c0_194 = arith.constant 0 : index
    %380 = memref.load %arg6[%c1_193, %c0_194] : memref<4x1xf32, #tpu.memory_space<smem>>
    %381 = vector.broadcast %380 : f32 to vector<8x128xf32>
    %382 = arith.mulf %311, %381 : vector<8x128xf32>
    %383 = arith.addf %379, %382 : vector<8x128xf32>
    %c2_195 = arith.constant 2 : index
    %c0_196 = arith.constant 0 : index
    %384 = memref.load %arg6[%c2_195, %c0_196] : memref<4x1xf32, #tpu.memory_space<smem>>
    %385 = vector.broadcast %384 : f32 to vector<8x128xf32>
    %386 = arith.mulf %342, %385 : vector<8x128xf32>
    %387 = arith.addf %383, %386 : vector<8x128xf32>
    %c3_197 = arith.constant 3 : index
    %c0_198 = arith.constant 0 : index
    %388 = memref.load %arg6[%c3_197, %c0_198] : memref<4x1xf32, #tpu.memory_space<smem>>
    %389 = vector.broadcast %388 : f32 to vector<8x128xf32>
    %390 = arith.mulf %373, %389 : vector<8x128xf32>
    %391 = arith.addf %387, %390 : vector<8x128xf32>
    %392 = arith.negf %391 : vector<8x128xf32>
    %393 = math.exp %392 : vector<8x128xf32>
    %cst_199 = arith.constant 1.000000e+00 : f32
    %394 = vector.broadcast %cst_199 : f32 to vector<8x128xf32>
    %395 = arith.addf %394, %393 : vector<8x128xf32>
    %396 = arith.divf %394, %395 : vector<8x128xf32>
    %c0_200 = arith.constant 0 : index
    %c0_201 = arith.constant 0 : index
    %397 = vector.load %arg8[%c0_200, %c0_201] : memref<8x128xf32, #tpu.memory_space<vmem>>, vector<8x128xf32>
    tpu.vector_store %arg8[%c0_200, %c0_201], %396 {strides = array<i32>} : memref<8x128xf32, #tpu.memory_space<vmem>>, vector<8x128xf32>,
    return
  }
  func.func @transform_0(%arg0: i32) -> (i32, i32, i32) {
    %c0_i32 = arith.constant 0 : i32
    %c0_i32_0 = arith.constant 0 : i32
    %c0_i32_1 = arith.constant 0 : i32
    return %c0_i32, %arg0, %c0_i32_0 : i32, i32, i32
  }
  func.func @transform_1(%arg0: i32) -> (i32, i32) {
    %c0_i32 = arith.constant 0 : i32
    %c0_i32_0 = arith.constant 0 : i32
    %c0_i32_1 = arith.constant 0 : i32
    return %c0_i32, %c0_i32_0 : i32, i32
  }
  func.func @transform_2(%arg0: i32) -> (i32, i32) {
    %c0_i32 = arith.constant 0 : i32
    %c0_i32_0 = arith.constant 0 : i32
    %c0_i32_1 = arith.constant 0 : i32
    return %c0_i32, %c0_i32_0 : i32, i32
  }
  func.func @transform_3(%arg0: i32) -> (i32, i32) {
    %c0_i32 = arith.constant 0 : i32
    %c0_i32_0 = arith.constant 0 : i32
    %c0_i32_1 = arith.constant 0 : i32
    return %c0_i32, %c0_i32_0 : i32, i32
  }
  func.func @transform_4(%arg0: i32) -> (i32, i32) {
    %c0_i32 = arith.constant 0 : i32
    %c0_i32_0 = arith.constant 0 : i32
    %c0_i32_1 = arith.constant 0 : i32
    return %c0_i32, %c0_i32_0 : i32, i32
  }
  func.func @transform_5(%arg0: i32) -> (i32, i32) {
    %c0_i32 = arith.constant 0 : i32
    %c0_i32_0 = arith.constant 0 : i32
    %c0_i32_1 = arith.constant 0 : i32
    return %c0_i32, %c0_i32_0 : i32, i32
  }
  func.func @transform_6(%arg0: i32) -> (i32, i32) {
    %c0_i32 = arith.constant 0 : i32
    %c0_i32_0 = arith.constant 0 : i32
    %c0_i32_1 = arith.constant 0 : i32
    return %c0_i32, %c0_i32_0 : i32, i32
  }
  func.func @transform_7(%arg0: i32) -> (i32, i32) {
    %c0_i32 = arith.constant 0 : i32
    %c0_i32_0 = arith.constant 0 : i32
    return %arg0, %c0_i32 : i32, i32
  }
}

</mosaic_0001>

<bundles_post_ra>
// kernel: tpu_custom_call.1
= control target key start
LH: loop header
LB: loop body
LE: loop exit
PB: predicated region body
PF: predicated region fallthrough
CT: control target
= control target key end

     0   :  { %13 = vsyncpa [#allocation4], 0  ;;  %s1476_s0 = inlined_call_operand.hbm [shape: f32[8,8,128], index: 0, kind: input, shape index: {}]   ;;  %s1477_s1 = inlined_call_operand.vmem [shape: f32[8,6], index: 1, kind: input, shape index: {}]   ;;  %s1478_s2 = inlined_call_operand.vmem [shape: f32[1,6], index: 2, kind: input, shape index: {}]   ;;  %s1479_s3 = inlined_call_operand.vmem [shape: f32[6,4], index: 3, kind: input, shape index: {}]   ;;  %s1480_s4 = inlined_call_operand.vmem [shape: f32[1,4], index: 4, kind: input, shape index: {}]   ;;  %s1481_s5 = inlined_call_operand.vmem [shape: f32[4,1], index: 5, kind: input, shape index: {}]   ;;  %s1482_s6 = inlined_call_operand.<no memory space> [shape: f32[1,1], index: 6, kind: input, shape index: {}]   ;;  %s1483_s7 = inlined_call_operand.hbm [shape: f32[8,128], index: 7, kind: output, shape index: {}]  }
   0x1   :  { %14 = vsyncpa [#allocation6], 0 }
   0x2   :  { %15 = vsyncpa [#allocation9], 0 }
   0x3   :  { %16 = vsyncpa [#allocation12], 0  ;;  %s45_s26 = sshll.u32 %s1478_s2, 4  ;;  %s46_s26 = int_to_ptr.vmem [resolvable:$true] %s45_s26 }
   0x4   :  { %17 = vsyncpa [#allocation5], 0  ;;  %s63_s29 = sshll.u32 %s1480_s4, 4  ;;  %s937_s30 = smov [#allocation8]   ;;  %s64_s29 = int_to_ptr.vmem [resolvable:$true] %s63_s29 }
   0x5   :  { %48 = dma.vmem_to_smem %s46_s26, 16, %s937_s30, [#allocation9]  }
   0x6   :  { %s938_s8 = smov [#allocation11]   ;;  %s22_s11 = sshll.u32 %s1476_s0, 4  ;;  %s23_s11 = int_to_ptr.hbm [resolvable:$true] %s22_s11 }
   0x7   :  { %66 = dma.vmem_to_smem %s64_s29, 16, %s938_s8, [#allocation12]  }
   0x8   :  { %s939_s12 = smov [#allocation3]   ;;  %s36_s15 = sshll.u32 %s1477_s1, 4  ;;  %s37_s15 = int_to_ptr.vmem [resolvable:$true] %s36_s15 }
   0x9   :  { %s24_s13 = sshll.u32 %s939_s12, 4  ;;  %s940_s16 = smov 128   ;;  %s25_s13 = int_to_ptr.vmem [resolvable:$true] %s24_s13 }
   0xa   :  { %s941_s17 = smov 8   ;;  %s942_s4 = smov [#allocation7]  }
   0xb   :  { %30 = dma.hbm_to_vmem [thread:$0]  %s23_s11, 1024, %s25_s13, [#allocation4], %s940_s16, %s940_s16, %s941_s17  }
   0xc   :  { %39 = dma.vmem_to_smem %s37_s15, 128, %s942_s4, [#allocation6]  }
   0xd   :  { %s54_s20 = sshll.u32 %s1479_s3, 4  ;;  %s72_s22 = sshll.u32 %s1481_s5, 4  ;;  %s55_s20 = int_to_ptr.vmem [resolvable:$true] %s54_s20  ;;  %s73_s22 = int_to_ptr.vmem [resolvable:$true] %s72_s22 }
   0xe   :  { %s943_s23 = smov [#allocation10]   ;;  %s944_s24 = smov [#allocation13]  }
   0xf   :  { %57 = dma.vmem_to_smem %s55_s20, 128, %s943_s23, [#allocation9]  }
  0x10   :  { %75 = dma.vmem_to_smem %s73_s22, 64, %s944_s24, [#allocation12]  }
  0x11   :  { %927 = dma.done.wait [#allocation4], 1024  }
  0x12   :  { %928 = vsyncadd [#allocation4], 4294966272 }
  0x13   :  { %929 = dma.done.wait [#allocation6], 128  }
  0x14   :  { %930 = vsyncadd [#allocation6], 4294967168 }
  0x15   :  { %931 = dma.done.wait [#allocation9], 144  }
  0x16   :  { %932 = vsyncadd [#allocation9], 4294967152 }
  0x17   :  { %933 = dma.done.wait [#allocation12], 80  }
  0x18   :  { %934 = vsyncadd [#allocation12], 4294967216 }
  0x19   :  { %102 = sfence }
  0x1a   :  { %s118_s1 = sld [smem:[#allocation7]]  ;;  %v1004_v0 = vld [vmem:[#allocation3] sm:$0xff]  ;;  %v1006_v1 = vld [vmem:[#allocation3 + $0x8] sm:$0xff]  ;;  %v1008_v3 = vld [vmem:[#allocation3 + $0x10] sm:$0xff] }
  0x1b   :  { %s121_s3 = sld [smem:[#allocation8]]  ;;  %v1013_v6 = vld [vmem:[#allocation3 + $0x18] sm:$0xff]  ;;  %v1018_v11 = vld [vmem:[#allocation3 + $0x20] sm:$0xff]  ;;  %v1022_v17 = vld [vmem:[#allocation3 + $0x28] sm:$0xff] }
  0x1c   :  { %s674_s25 = sld [smem:[#allocation7 + $0x80]]  ;;  %v1025_v21 = vld [vmem:[#allocation3 + $0x30] sm:$0xff]  ;;  %v1033_v26 = vld [vmem:[#allocation3 + $0x38] sm:$0xff] }
  0x1d   :  { %s675_s26 = sld [smem:[#allocation7 + $0x100]] }
  0x1e   :  { %s676_s5 = sld [smem:[#allocation7 + $0x180]] }
  0x1f   :  { %s677_s27 = sld [smem:[#allocation7 + $0x200]] }
  0x20   :  { %v119_v2 = vstv %s118_s1  ;;  %s678_s28 = sld [smem:[#allocation7 + $0x280]] }
  0x21   :  { %v120_v4 = vmul.f32 %v119_v2, %v1004_v0  ;;  %v122_v5 = vstv %s121_s3  ;;  %s1011_s29 = sld [smem:[#allocation7 + $0x300]] }
  0x22   :  { %v125_v7 = vstv %s674_s25  ;;  %s1015_s30 = sld [smem:[#allocation7 + $0x380]] }
  0x23   :  { %v123_v8 = vadd.f32 %v122_v5, %v120_v4  ;;  %v126_v9 = vmul.f32 %v125_v7, %v1006_v1  ;;  %v129_v10 = vstv %s675_s26  ;;  %s682_s8 = sld [smem:[#allocation7 + $0x1]] }
  0x24   :  { %v130_v12 = vmul.f32 %v129_v10, %v1008_v3  ;;  %v133_v13 = vstv %s676_s5  ;;  %s683_s9 = sld [smem:[#allocation8 + $0x1]] }
  0x25   :  { %v127_v14 = vadd.f32 %v126_v9, %v123_v8  ;;  %v134_v15 = vmul.f32 %v133_v13, %v1013_v6  ;;  %v137_v16 = vstv %s677_s27  ;;  %s684_s10 = sld [smem:[#allocation7 + $0x81]] }
  0x26   :  { %v141_v18 = vstv %s678_s28  ;;  %s685_s11 = sld [smem:[#allocation7 + $0x101]]  ;;  %v138_v20 = vmul.f32 %v137_v16, %v1018_v11 }
  0x27   :  { %v131_v19 = vadd.f32 %v130_v12, %v127_v14  ;;  %s686_s12 = sld [smem:[#allocation7 + $0x181]]  ;;  %v145_v22 = vstv %s1011_s29  ;;  %v142_v24 = vmul.f32 %v141_v18, %v1022_v17 }
  0x28   :  { %s1028_s13 = sld [smem:[#allocation7 + $0x201]]  ;;  %v149_v27 = vstv %s1015_s30  ;;  %v146_v31 = vmul.f32 %v145_v22, %v1025_v21 }
  0x29   :  { %v135_v23 = vadd.f32 %v134_v15, %v131_v19  ;;  %v172_v25 = vstv %s682_s8  ;;  %s1031_s2 = sld [smem:[#allocation7 + $0x281]]  ;;  %v150_v37 = vmul.f32 %v149_v27, %v1033_v26 }
  0x2a   :  { %v173_v28 = vmul.f32 %v172_v25, %v1004_v0  ;;  %v175_v29 = vstv %s683_s9  ;;  %s1037_s14 = sld [smem:[#allocation7 + $0x301]] }
  0x2b   :  { %v139_v30 = vadd.f32 %v138_v20, %v135_v23  ;;  %v178_v32 = vstv %s684_s10  ;;  %s1040_s15 = sld [smem:[#allocation7 + $0x381]] }
  0x2c   :  { %v176_v33 = vadd.f32 %v175_v29, %v173_v28  ;;  %v179_v34 = vmul.f32 %v178_v32, %v1006_v1  ;;  %v182_v35 = vstv %s685_s11  ;;  %s692_s16 = sld [smem:[#allocation7 + $0x2]] }
  0x2d   :  { %v143_v36 = vadd.f32 %v142_v24, %v139_v30  ;;  %v183_v38 = vmul.f32 %v182_v35, %v1008_v3  ;;  %v186_v39 = vstv %s686_s12  ;;  %s693_s17 = sld [smem:[#allocation8 + $0x2]] }
  0x2e   :  { %v180_v40 = vadd.f32 %v179_v34, %v176_v33  ;;  %v187_v41 = vmul.f32 %v186_v39, %v1013_v6  ;;  %v190_v42 = vstv %s1028_s13  ;;  %s694_s4 = sld [smem:[#allocation7 + $0x82]] }
  0x2f   :  { %v147_v43 = vadd.f32 %v146_v31, %v143_v36  ;;  %v194_v44 = vstv %s1031_s2  ;;  %s695_s18 = sld [smem:[#allocation7 + $0x102]]  ;;  %v191_v46 = vmul.f32 %v190_v42, %v1018_v11 }
  0x30   :  { %v184_v45 = vadd.f32 %v183_v38, %v180_v40  ;;  %s696_s19 = sld [smem:[#allocation7 + $0x182]]  ;;  %v198_v48 = vstv %s1037_s14  ;;  %v195_v50 = vmul.f32 %v194_v44, %v1022_v17 }
  0x31   :  { %v151_v47 = vadd.f32 %v150_v37, %v147_v43  ;;  %s1050_s20 = sld [smem:[#allocation7 + $0x202]]  ;;  %v202_v53 = vstv %s1040_s15  ;;  %v199_v57 = vmul.f32 %v198_v48, %v1025_v21 }
  0x32   :  { %v188_v49 = vadd.f32 %v187_v41, %v184_v45  ;;  %v225_v51 = vstv %s692_s16  ;;  %s1053_s0 = sld [smem:[#allocation7 + $0x282]]  ;;  %v203_v63 = vmul.f32 %v202_v53, %v1033_v26 }
  0x33   :  { %v681_v52 = vmul.f32 -1.442695, %v151_v47  ;;  %v226_v54 = vmul.f32 %v225_v51, %v1004_v0  ;;  %v228_v55 = vstv %s693_s17  ;;  %s1057_s21 = sld [smem:[#allocation7 + $0x302]] }
  0x34   :  { %v192_v56 = vadd.f32 %v191_v46, %v188_v49  ;;  %v231_v58 = vstv %s694_s4  ;;  %s1060_s22 = sld [smem:[#allocation7 + $0x382]] }
  0x35   :  { %775 = vpow2.f32 %v681_v52  ;;  %v229_v59 = vadd.f32 %v228_v55, %v226_v54  ;;  %v232_v60 = vmul.f32 %v231_v58, %v1006_v1  ;;  %v235_v61 = vstv %s695_s18  ;;  %s702_s23 = sld [smem:[#allocation7 + $0x3]] }
  0x36   :  { %v196_v62 = vadd.f32 %v195_v50, %v192_v56  ;;  %v236_v2 = vmul.f32 %v235_v61, %v1008_v3  ;;  %v239_v4 = vstv %s696_s19  ;;  %s1065_s24 = sld [smem:[#allocation8 + $0x3]] }
  0x37   :  { %v233_v5 = vadd.f32 %v232_v60, %v229_v59  ;;  %v240_v7 = vmul.f32 %v239_v4, %v1013_v6  ;;  %v243_v8 = vstv %s1050_s20  ;;  %s704_s1 = sld [smem:[#allocation7 + $0x83]] }
  0x38   :  { %v200_v9 = vadd.f32 %v199_v57, %v196_v62  ;;  %v247_v10 = vstv %s1053_s0  ;;  %s1070_s3 = sld [smem:[#allocation7 + $0x103]]  ;;  %v244_v13 = vmul.f32 %v243_v8, %v1018_v11 }
  0x39   :  { %v237_v12 = vadd.f32 %v236_v2, %v233_v5  ;;  %s1073_s25 = sld [smem:[#allocation7 + $0x183]]  ;;  %v251_v15 = vstv %s1057_s21  ;;  %v248_v19 = vmul.f32 %v247_v10, %v1022_v17 }
  0x3a   :  { %v204_v14 = vadd.f32 %v203_v63, %v200_v9  ;;  %s1076_s26 = sld [smem:[#allocation7 + $0x203]]  ;;  %v255_v20 = vstv %s1060_s22  ;;  %v252_v28 = vmul.f32 %v251_v15, %v1025_v21 }
  0x3b   :  { %v776_v16 = vpop.eup %775  ;;  %v241_v18 = vadd.f32 %v240_v7, %v237_v12  ;;  %v278_v22 = vstv %s702_s23  ;;  %s1080_s5 = sld [smem:[#allocation7 + $0x283]]  ;;  %v256_v31 = vmul.f32 %v255_v20, %v1033_v26 }
  0x3c   :  { %v691_v23 = vmul.f32 -1.442695, %v204_v14  ;;  %v279_v24 = vmul.f32 %v278_v22, %v1004_v0  ;;  %v281_v25 = vstv %s1065_s24  ;;  %s1084_s27 = sld [smem:[#allocation7 + $0x303]]  ;;  %v1089_v30 = vadd.f32 1.0, %v776_v16 }
  0x3d   :  { %v245_v27 = vadd.f32 %v244_v13, %v241_v18  ;;  %v284_v29 = vstv %s704_s1  ;;  %s1087_s28 = sld [smem:[#allocation7 + $0x383]] }
  0x3e   :  { %s1092_s29 = sld [smem:[#allocation7 + $0x4]]  ;;  %777 = vpow2.f32 %v691_v23  ;;  %v282_v33 = vadd.f32 %v281_v25, %v279_v24  ;;  %v285_v34 = vmul.f32 %v284_v29, %v1006_v1  ;;  %v288_v35 = vstv %s1070_s3 }
  0x3f   :  { %v249_v32 = vadd.f32 %v248_v19, %v245_v27  ;;  %s1095_s30 = sld [smem:[#allocation8 + $0x4]]  ;;  %v292_v36 = vstv %s1073_s25  ;;  %v289_v39 = vmul.f32 %v288_v35, %v1008_v3  ;;  %779 = vrcp.f32 %v1089_v30 }
  0x40   :  { %s1099_s8 = sld [smem:[#allocation7 + $0x84]]  ;;  %v286_v38 = vadd.f32 %v285_v34, %v282_v33  ;;  %v293_v40 = vmul.f32 %v292_v36, %v1013_v6  ;;  %v296_v41 = vstv %s1076_s26  ;;  %vm161_vm0 = vweird.f32 %v1089_v30 }
  0x41   :  { %v253_v37 = vadd.f32 %v252_v28, %v249_v32  ;;  %s1103_s9 = sld [smem:[#allocation7 + $0x104]]  ;;  %v300_v42 = vstv %s1080_s5  ;;  %v297_v45 = vmul.f32 %v296_v41, %v1018_v11 }
  0x42   :  { %s1107_s10 = sld [smem:[#allocation7 + $0x184]]  ;;  %v290_v44 = vadd.f32 %v289_v39, %v286_v38  ;;  %v304_v46 = vstv %s1084_s27  ;;  %v301_v51 = vmul.f32 %v300_v42, %v1022_v17  ;;  %v165_v38 = vand.u32 2147483647, %v1089_v30 }
  0x43   :  { %v257_v43 = vadd.f32 %v256_v31, %v253_v37  ;;  %s1111_s11 = sld [smem:[#allocation7 + $0x204]]  ;;  %v308_v53 = vstv %s1087_s28  ;;  %v305_v57 = vmul.f32 %v304_v46, %v1025_v21 }
  0x44   :  { %v331_v47 = vstv %s1092_s29  ;;  %s1115_s12 = sld [smem:[#allocation7 + $0x284]]  ;;  %v778_v48 = vpop.eup %777  ;;  %v294_v50 = vadd.f32 %v293_v40, %v290_v44  ;;  %v309_v61 = vmul.f32 %v308_v53, %v1033_v26  ;;  %vm1215_vm5 = vcmp.eq.f32.partialorder %v165_v38, 8.507059e+37 }
  0x45   :  { %v701_v49 = vmul.f32 -1.442695, %v257_v43  ;;  %v1118_v52 = vadd.f32 1.0, %v778_v48  ;;  %v332_v54 = vmul.f32 %v331_v47, %v1004_v0  ;;  %v334_v55 = vstv %s1095_s30  ;;  %s1123_s13 = sld [smem:[#allocation7 + $0x304]]  ;;  %v1130_v59 = vpop.eup %779 }
  0x46   :  { %v298_v56 = vadd.f32 %v297_v45, %v294_v50  ;;  %v337_v58 = vstv %s1099_s8  ;;  %s1128_s2 = sld [smem:[#allocation7 + $0x384]]  ;;  %v157_v9 = vmul.f32 %v1130_v59, %v1089_v30  ;;  %vm162_vm1 = vweird.f32 %v1130_v59 }
  0x47   :  { %781 = vpow2.f32 %v701_v49  ;;  %v335_v62 = vadd.f32 %v334_v55, %v332_v54  ;;  %v338_v63 = vmul.f32 %v337_v58, %v1006_v1  ;;  %s1134_s14 = sld [smem:[#allocation7 + $0x5]]  ;;  %v341_v2 = vstv %s1103_s9  ;;  %vm1204_vm3 = vmor %vm161_vm0, %vm162_vm1 }
  0x48   :  { %783 = vrcp.f32 %v1118_v52  ;;  %v302_v60 = vadd.f32 %v301_v51, %v298_v56  ;;  %v345_v4 = vstv %s1107_s10  ;;  %s1138_s15 = sld [smem:[#allocation8 + $0x5]]  ;;  %v342_v8 = vmul.f32 %v341_v2, %v1008_v3 }
  0x49   :  { %v339_v7 = vadd.f32 %v338_v63, %v335_v62  ;;  %s1141_s16 = sld [smem:[#allocation7 + $0x85]]  ;;  %v346_v10 = vmul.f32 %v345_v4, %v1013_v6  ;;  %v349_v12 = vstv %s1111_s11  ;;  %v158_v27 = vsub.f32 1.0, %v157_v9 }
  0x4a   :  { %v306_v5 = vadd.f32 %v305_v57, %v302_v60  ;;  %v353_v13 = vstv %s1115_s12  ;;  %s1148_s17 = sld [smem:[#allocation7 + $0x105]]  ;;  %v350_v18 = vmul.f32 %v349_v12, %v1018_v11  ;;  %vm214_vm2 = vweird.f32 %v1118_v52 }
  0x4b   :  { %v343_v16 = vadd.f32 %v342_v8, %v339_v7  ;;  %v357_v22 = vstv %s1123_s13  ;;  %s1156_s4 = sld [smem:[#allocation7 + $0x185]]  ;;  %v354_v25 = vmul.f32 %v353_v13, %v1022_v17  ;;  %v159_v42 = vmul.f32 %v1130_v59, %v158_v27 }
  0x4c   :  { %v310_v15 = vadd.f32 %v309_v61, %v306_v5  ;;  %s1162_s18 = sld [smem:[#allocation7 + $0x205]]  ;;  %v358_v31 = vmul.f32 %v357_v22, %v1025_v21  ;;  %v361_v32 = vstv %s1128_s2  ;;  %v218_v49 = vand.u32 2147483647, %v1118_v52 }
  0x4d   :  { %v782_v14 = vpop.eup %781  ;;  %v347_v24 = vadd.f32 %v346_v10, %v343_v16  ;;  %v384_v33 = vstv %s1134_s14  ;;  %s1168_s19 = sld [smem:[#allocation7 + $0x285]]  ;;  %v362_v35 = vmul.f32 %v361_v32, %v1033_v26  ;;  %v160_v57 = vadd.f32 %v1130_v59, %v159_v42 }
  0x4e   :  { %v1151_v19 = vpop.eup %783  ;;  %v1153_v20 = vadd.f32 1.0, %v782_v14  ;;  %v711_v23 = vmul.f32 -1.442695, %v310_v15  ;;  %v385_v36 = vmul.f32 %v384_v33, %v1004_v0  ;;  %v387_v37 = vstv %s1138_s15  ;;  %s1176_s20 = sld [smem:[#allocation7 + $0x305]] }
  0x4f   :  { %v210_v28 = vmul.f32 %v1151_v19, %v1118_v52  ;;  %v351_v29 = vadd.f32 %v350_v18, %v347_v24  ;;  %v390_v40 = vstv %s1141_s16  ;;  %v167_v0 = vand.u32 2147483648, %v1089_v30  ;;  %s1186_s0 = sld [smem:[#allocation7 + $0x385]] }
  0x50   :  { %785 = vrcp.f32 %v1153_v20  ;;  %v394_v41 = vstv %s1148_s17  ;;  %v388_v44 = vadd.f32 %v387_v37, %v385_v36  ;;  %v391_v45 = vmul.f32 %v390_v40, %v1006_v1  ;;  %s1196_s21 = sld [smem:[#allocation10]] }
  0x51   :  { %787 = vpow2.f32 %v711_v23  ;;  %v355_v34 = vadd.f32 %v354_v25, %v351_v29  ;;  %v211_v39 = vsub.f32 1.0, %v210_v28  ;;  %v398_v47 = vstv %s1156_s4  ;;  %s1213_s22 = sld [smem:[#allocation11]] }
  0x52   :  { %v395_v1 = vmul.f32 %v394_v41, %v1008_v3  ;;  %v392_v55 = vadd.f32 %v391_v45, %v388_v44  ;;  %v402_v56 = vstv %s1162_s18  ;;  %v399_v61 = vmul.f32 %v398_v47, %v1013_v6  ;;  %s1221_s23 = sld [smem:[#allocation10 + $0x80]] }
  0x53   :  { %v359_v43 = vadd.f32 %v358_v31, %v355_v34  ;;  %v212_v53 = vmul.f32 %v1151_v19, %v211_v39  ;;  %vm215_vm4 = vweird.f32 %v1151_v19  ;;  %v220_v62 = vand.u32 2147483648, %v1118_v52  ;;  %s1234_s24 = sld [smem:[#allocation10 + $0x1]] }
  0x54   :  { %v406_v63 = vstv %s1168_s19  ;;  %v396_v2 = vadd.f32 %v395_v1, %v392_v55  ;;  %v403_v4 = vmul.f32 %v402_v56, %v1018_v11  ;;  %v168_v30 = vor.u32 1.1754944e-38, %v167_v0  ;;  %vm1228_vm6 = vmor %vm214_vm2, %vm215_vm4  ;;  %s1242_s1 = sld [smem:[#allocation10 + $0x100]] }
  0x55   :  { %v363_v51 = vadd.f32 %v362_v35, %v359_v43  ;;  %v213_v5 = vadd.f32 %v1151_v19, %v212_v53  ;;  %v410_v7 = vstv %s1176_s20  ;;  %v164_v8 = vsel %vm1204_vm3, %v1130_v59, %v160_v57  ;;  %s1247_s3 = sld [smem:[#allocation10 + $0x180]] }
  0x56   :  { %v1180_v46 = vpop.eup %785  ;;  %v400_v10 = vadd.f32 %v399_v61, %v396_v2  ;;  %v407_v12 = vmul.f32 %v406_v63, %v1022_v17  ;;  %vm1236_vm7 = vcmp.eq.f32.partialorder %v218_v49, 8.507059e+37  ;;  %v221_v14 = vor.u32 1.1754944e-38, %v220_v62  ;;  %s1260_s25 = sld [smem:[#allocation11 + $0x1]] }
  0x57   :  { %v788_v48 = vpop.eup %787  ;;  %v263_v50 = vmul.f32 %v1180_v46, %v1153_v20  ;;  %v721_v60 = vmul.f32 -1.442695, %v363_v51  ;;  %vm267_vm8 = vweird.f32 %v1153_v20  ;;  %v414_v52 = vstv %s1186_s0  ;;  %s1266_s26 = sld [smem:[#allocation10 + $0x2]] }
  0x58   :  { %v1193_v54 = vadd.f32 1.0, %v788_v48  ;;  %vm268_vm9 = vweird.f32 %v1180_v46  ;;  %v273_v59 = vand.u32 2147483648, %v1153_v20  ;;  %v404_v15 = vadd.f32 %v403_v4, %v400_v10  ;;  %s1278_s5 = sld [smem:[#allocation10 + $0x81]] }
  0x59   :  { %v264_v58 = vsub.f32 1.0, %v263_v50  ;;  %v411_v17 = vmul.f32 %v410_v7, %v1025_v21  ;;  %v1253_v18 = vsel %vm1215_vm5, %v168_v30, %v164_v8  ;;  %v217_v22 = vsel %vm1228_vm6, %v1151_v19, %v213_v5  ;;  %vm1272_vm10 = vmor %vm267_vm8, %vm268_vm9  ;;  %s1281_s27 = sld [smem:[#allocation11 + $0x2]] }
  0x5a   :  { %789 = vrcp.f32 %v1193_v54  ;;  %v271_v23 = vand.u32 2147483647, %v1153_v20  ;;  %v437_v24 = vstv %s1196_s21  ;;  %v408_v28 = vadd.f32 %v407_v12, %v404_v15  ;;  %s1290_s28 = sld [smem:[#allocation10 + $0x82]] }
  0x5b   :  { %791 = vpow2.f32 %v721_v60  ;;  %v265_v9 = vmul.f32 %v1180_v46, %v264_v58  ;;  %v415_v29 = vmul.f32 %v414_v52, %v1033_v26  ;;  %v274_v32 = vor.u32 1.1754944e-38, %v273_v59  ;;  %s1296_s29 = sld [smem:[#allocation10 + $0x3]] }
  0x5c   :  { %v412_v34 = vadd.f32 %v411_v17, %v408_v28  ;;  %v438_v26 = vmul.f32 %v437_v24, %v1253_v18  ;;  %v1285_v35 = vsel %vm1236_vm7, %v221_v14, %v217_v22  ;;  %v440_v20 = vstv %s1213_s22  ;;  %s1300_s30 = sld [smem:[#allocation11 + $0x3]] }
  0x5d   :  { %v266_v21 = vadd.f32 %v1180_v46, %v265_v9  ;;  %v443_v36 = vstv %s1221_s23  ;;  %vm272_vm11 = vcmp.eq.f32.partialorder %v271_v23, 8.507059e+37  ;;  %v482_v39 = vstv %s1234_s24  ;;  %s1304_s8 = sld [smem:[#allocation10 + $0x83]] }
  0x5e   :  { %v416_v38 = vadd.f32 %v415_v29, %v412_v34  ;;  %v324_v40 = vand.u32 2147483647, %v1193_v54  ;;  %v326_v41 = vand.u32 2147483648, %v1193_v54  ;;  %v441_v44 = vadd.f32 %v440_v20, %v438_v26  ;;  %s1311_s9 = sld [smem:[#allocation10 + $0x101]] }
  0x5f   :  { %v270_v37 = vsel %vm1272_vm10, %v1180_v46, %v266_v21  ;;  %v444_v45 = vmul.f32 %v443_v36, %v1285_v35  ;;  %vm320_vm12 = vweird.f32 %v1193_v54  ;;  %v447_v0 = vstv %s1242_s1  ;;  %s1316_s10 = sld [smem:[#allocation10 + $0x102]]  ;;  %s945_s1 = smov [#allocation14]  }
  0x60   :  { %v1249_v16 = vpop.eup %789  ;;  %v731_v43 = vmul.f32 -1.442695, %v416_v38  ;;  %v1306_v46 = vsel %vm272_vm11, %v274_v32, %v270_v37  ;;  %v483_v47 = vmul.f32 %v482_v39, %v1253_v18  ;;  %v485_v48 = vstv %s1260_s25  ;;  %s1324_s11 = sld [smem:[#allocation10 + $0x103]] }
  0x61   :  { %v792_v25 = vpop.eup %791  ;;  %v316_v27 = vmul.f32 %v1249_v16, %v1193_v54  ;;  %vm321_vm13 = vweird.f32 %v1249_v16  ;;  %v527_v49 = vstv %s1266_s26  ;;  %vm1320_vm14 = vcmp.eq.f32.partialorder %v324_v40, 8.507059e+37  ;;  %s1329_s12 = sld [smem:[#allocation10 + $0x200]] }
  0x62   :  { %v1276_v31 = vadd.f32 1.0, %v792_v25  ;;  %v327_v53 = vor.u32 1.1754944e-38, %v326_v41  ;;  %v445_v56 = vadd.f32 %v444_v45, %v441_v44  ;;  %vm1333_vm15 = vmor %vm320_vm12, %vm321_vm13  ;;  %v448_v58 = vmul.f32 %v447_v0, %v1306_v46  ;;  %s1339_s13 = sld [smem:[#allocation10 + $0x181]] }
  0x63   :  { %v317_v33 = vsub.f32 1.0, %v316_v27  ;;  %v486_v60 = vadd.f32 %v485_v48, %v483_v47  ;;  %v488_v61 = vstv %s1278_s5  ;;  %v528_v3 = vmul.f32 %v527_v49, %v1253_v18  ;;  %s1345_s2 = sld [smem:[#allocation10 + $0x182]]  ;;  %s661_s5 = sshll.u32 %s1483_s7, 4  ;;  %s662_s5 = int_to_ptr.hbm [resolvable:$true] %s661_s5 }
  0x64   :  { %793 = vrcp.f32 %v1276_v31  ;;  %vm373_vm0 = vweird.f32 %v1276_v31  ;;  %v530_v63 = vstv %s1281_s27  ;;  %v533_v2 = vstv %s1290_s28  ;;  %s1351_s14 = sld [smem:[#allocation10 + $0x183]] }
  0x65   :  { %v318_v42 = vmul.f32 %v1249_v16, %v317_v33  ;;  %795 = vpow2.f32 %v731_v43  ;;  %v379_v54 = vand.u32 2147483648, %v1276_v31  ;;  %v572_v4 = vstv %s1296_s29  ;;  %s1358_s15 = sld [smem:[#allocation10 + $0x201]] }
  0x66   :  { %v575_v6 = vstv %s1300_s30  ;;  %v578_v30 = vstv %s1304_s8  ;;  %v489_v11 = vmul.f32 %v488_v61, %v1285_v35  ;;  %v573_v9 = vmul.f32 %v572_v4, %v1253_v18  ;;  %s1367_s16 = sld [smem:[#allocation10 + $0x202]] }
  0x67   :  { %v319_v1 = vadd.f32 %v1249_v16, %v318_v42  ;;  %v531_v12 = vadd.f32 %v530_v63, %v528_v3  ;;  %v534_v13 = vmul.f32 %v533_v2, %v1285_v35  ;;  %v492_v14 = vstv %s1311_s9  ;;  %s1374_s17 = sld [smem:[#allocation10 + $0x203]] }
  0x68   :  { %v537_v52 = vstv %s1316_s10  ;;  %v576_v59 = vadd.f32 %v575_v6, %v573_v9  ;;  %v579_v15 = vmul.f32 %v578_v30, %v1285_v35  ;;  %v582_v18 = vstv %s1324_s11  ;;  %s1389_s4 = sld [smem:[#allocation10 + $0x280]] }
  0x69   :  { %v323_v7 = vsel %vm1333_vm15, %v1249_v16, %v319_v1  ;;  %v377_v16 = vand.u32 2147483647, %v1276_v31  ;;  %v380_v24 = vor.u32 1.1754944e-38, %v379_v54  ;;  %v449_v25 = vadd.f32 %v448_v58, %v445_v56  ;;  %s1397_s18 = sld [smem:[#allocation10 + $0x281]] }
  0x6a   :  { %v1318_v50 = vpop.eup %793  ;;  %v328_v22 = vsel %vm1320_vm14, %v327_v53, %v323_v7  ;;  %v451_v21 = vstv %s1247_s3  ;;  %v490_v27 = vadd.f32 %v489_v11, %v486_v60  ;;  %v493_v28 = vmul.f32 %v492_v14, %v1306_v46  ;;  %s1402_s19 = sld [smem:[#allocation10 + $0x282]]  ;;  %s659_s3 = sshll.u32 %s945_s1, 4  ;;  %s660_s3 = int_to_ptr.vmem [resolvable:$true] %s659_s3 }
  0x6b   :  { %v369_v55 = vmul.f32 %v1318_v50, %v1276_v31  ;;  %v796_v5 = vpop.eup %795  ;;  %vm374_vm1 = vweird.f32 %v1318_v50  ;;  %v535_v29 = vadd.f32 %v534_v13, %v531_v12  ;;  %v538_v19 = vmul.f32 %v537_v52, %v1306_v46  ;;  %s1404_s20 = sld [smem:[#allocation10 + $0x283]] }
  0x6c   :  { %v1362_v10 = vadd.f32 1.0, %v796_v5  ;;  %vm1382_vm2 = vmor %vm373_vm0, %vm374_vm1  ;;  %v496_v32 = vstv %s1339_s13  ;;  %v541_v31 = vstv %s1345_s2  ;;  %v580_v33 = vadd.f32 %v579_v15, %v576_v59  ;;  %s1416_s0 = sld [smem:[#allocation13]] }
  0x6d   :  { %v370_v62 = vsub.f32 1.0, %v369_v55  ;;  %v583_v34 = vmul.f32 %v582_v18, %v1306_v46  ;;  %vm378_vm3 = vcmp.eq.f32.partialorder %v377_v16, 8.507059e+37  ;;  %v452_v35 = vmul.f32 %v451_v21, %v328_v22  ;;  %s1419_s21 = sld [smem:[#allocation13 + $0x80]] }
  0x6e   :  { %797 = vrcp.f32 %v1362_v10  ;;  %v586_v20 = vstv %s1351_s14  ;;  %v455_v36 = vstv %s1329_s12  ;;  %v500_v37 = vstv %s1358_s15  ;;  %s1432_s24 = sld [smem:[#allocation13 + $0x100]] }
  0x6f   :  { %v371_v8 = vmul.f32 %v1318_v50, %v370_v62  ;;  %v494_v39 = vadd.f32 %v493_v28, %v490_v27  ;;  %v497_v40 = vmul.f32 %v496_v32, %v328_v22  ;;  %v539_v41 = vadd.f32 %v538_v19, %v535_v29 }
  0x70   :  { %v542_v42 = vmul.f32 %v541_v31, %v328_v22  ;;  %v584_v45 = vadd.f32 %v583_v34, %v580_v33  ;;  %v587_v46 = vmul.f32 %v586_v20, %v328_v22  ;;  %v432_v0 = vand.u32 2147483648, %v1362_v10 }
  0x71   :  { %v372_v17 = vadd.f32 %v1318_v50, %v371_v8  ;;  %v453_v47 = vadd.f32 %v452_v35, %v449_v25  ;;  %v545_v48 = vstv %s1367_s16  ;;  %v590_v49 = vstv %s1374_s17 }
  0x72   :  { %vm426_vm4 = vweird.f32 %v1362_v10  ;;  %v430_v51 = vand.u32 2147483647, %v1362_v10  ;;  %v498_v53 = vadd.f32 %v497_v40, %v494_v39  ;;  %v543_v56 = vadd.f32 %v542_v42, %v539_v41 }
  0x73   :  { %v376_v26 = vsel %vm1382_vm2, %v1318_v50, %v372_v17  ;;  %v588_v60 = vadd.f32 %v587_v46, %v584_v45  ;;  %v433_v3 = vor.u32 1.1754944e-38, %v432_v0  ;;  %v459_v63 = vstv %s1389_s4 }
  0x74   :  { %v798_v38 = vpop.eup %797  ;;  %v381_v43 = vsel %vm378_vm3, %v380_v24, %v376_v26  ;;  %vm431_vm7 = vcmp.eq.f32.partialorder %v430_v51, 8.507059e+37  ;;  %v504_v54 = vstv %s1397_s18  ;;  %v549_v4 = vstv %s1402_s19 }
  0x75   :  { %v422_v44 = vmul.f32 %v798_v38, %v1362_v10  ;;  %vm427_vm5 = vweird.f32 %v798_v38  ;;  %v456_v1 = vmul.f32 %v455_v36, %v381_v43  ;;  %v501_v55 = vmul.f32 %v500_v37, %v381_v43 }
  0x76   :  { %v546_v58 = vmul.f32 %v545_v48, %v381_v43  ;;  %v591_v61 = vmul.f32 %v590_v49, %v381_v43  ;;  %vm428_vm6 = vmor %vm426_vm4, %vm427_vm5  ;;  %v594_v6 = vstv %s1404_s20  ;;  %v617_v36 = vstv %s1416_s0 }
  0x77   :  { %v423_v50 = vsub.f32 1.0, %v422_v44  ;;  %v457_v2 = vadd.f32 %v456_v1, %v453_v47  ;;  %v502_v5 = vadd.f32 %v501_v55, %v498_v53 }
  0x78   :  { %v547_v7 = vadd.f32 %v546_v58, %v543_v56  ;;  %v592_v8 = vadd.f32 %v591_v61, %v588_v60 }
  0x79   :  { %v424_v57 = vmul.f32 %v798_v38, %v423_v50 }
  0x7b   :  { %v425_v62 = vadd.f32 %v798_v38, %v424_v57 }
  0x7d   :  { %v429_v30 = vsel %vm428_vm6, %v798_v38, %v425_v62  ;;  %v620_v38 = vstv %s1482_s6  ;;  %s1434_s6 = sld [smem:[#allocation13 + $0x180]] }
  0x7e   :  { %v434_v11 = vsel %vm431_vm7, %v433_v3, %v429_v30 }
  0x7f   :  { %v460_v9 = vmul.f32 %v459_v63, %v434_v11  ;;  %v505_v10 = vmul.f32 %v504_v54, %v434_v11  ;;  %v550_v12 = vmul.f32 %v549_v4, %v434_v11  ;;  %v595_v13 = vmul.f32 %v594_v6, %v434_v11 }
  0x81   :  { %v461_v14 = vadd.f32 %v460_v9, %v457_v2  ;;  %v506_v52 = vadd.f32 %v505_v10, %v502_v5  ;;  %v551_v59 = vadd.f32 %v550_v12, %v547_v7  ;;  %v596_v15 = vadd.f32 %v595_v13, %v592_v8 }
  0x82   :  { %v623_v2 = vstv %s1419_s21  ;;  %v627_v13 = vstv %s1432_s24 }
  0x83   :  { %v737_v17 = vmul.f32 -1.442695, %v461_v14  ;;  %v745_v16 = vmul.f32 -1.442695, %v506_v52  ;;  %v753_v18 = vmul.f32 -1.442695, %v551_v59  ;;  %v631_v59 = vstv %s1434_s6 }
  0x84   :  { %v761_v22 = vmul.f32 -1.442695, %v596_v15 }
  0x85   :  { %799 = vpow2.f32 %v737_v17 }
  0x86   :  { %801 = vpow2.f32 %v745_v16 }
  0x87   :  { %803 = vpow2.f32 %v753_v18 }
  0x88   :  { %805 = vpow2.f32 %v761_v22 }
  0x8b   :  { %v800_v23 = vpop.eup %799 }
  0x8c   :  { %v802_v24 = vpop.eup %801  ;;  %v465_v25 = vadd.f32 1.0, %v800_v23 }
  0x8d   :  { %v804_v21 = vpop.eup %803  ;;  %v510_v27 = vadd.f32 1.0, %v802_v24 }
  0x8e   :  { %v806_v28 = vpop.eup %805  ;;  %807 = vrcp.f32 %v465_v25  ;;  %v555_v29 = vadd.f32 1.0, %v804_v21  ;;  %v475_v32 = vand.u32 2147483647, %v465_v25  ;;  %v477_v31 = vand.u32 2147483648, %v465_v25 }
  0x8f   :  { %809 = vrcp.f32 %v510_v27  ;;  %v600_v19 = vadd.f32 1.0, %v806_v28  ;;  %v520_v34 = vand.u32 2147483647, %v510_v27  ;;  %v522_v26 = vand.u32 2147483648, %v510_v27 }
  0x90   :  { %811 = vrcp.f32 %v555_v29  ;;  %vm471_vm8 = vweird.f32 %v465_v25  ;;  %vm516_vm9 = vweird.f32 %v510_v27  ;;  %vm1424_vm11 = vcmp.eq.f32.partialorder %v475_v32, 8.507059e+37 }
  0x91   :  { %813 = vrcp.f32 %v600_v19  ;;  %v478_v41 = vor.u32 1.1754944e-38, %v477_v31  ;;  %vm1428_vm13 = vcmp.eq.f32.partialorder %v520_v34, 8.507059e+37  ;;  %v523_v45 = vor.u32 1.1754944e-38, %v522_v26 }
  0x92   :  { %vm561_vm14 = vweird.f32 %v555_v29  ;;  %v565_v48 = vand.u32 2147483647, %v555_v29  ;;  %v567_v51 = vand.u32 2147483648, %v555_v29  ;;  %vm606_vm0 = vweird.f32 %v600_v19 }
  0x93   :  { %v612_v57 = vand.u32 2147483648, %v600_v19  ;;  %v610_v61 = vand.u32 2147483647, %v600_v19 }
  0x94   :  { %v808_v33 = vpop.eup %807  ;;  %vm1450_vm4 = vcmp.eq.f32.partialorder %v565_v48, 8.507059e+37  ;;  %v568_v30 = vor.u32 1.1754944e-38, %v567_v51 }
  0x95   :  { %v810_v35 = vpop.eup %809  ;;  %v467_v20 = vmul.f32 %v808_v33, %v465_v25  ;;  %vm472_vm10 = vweird.f32 %v808_v33  ;;  %v613_v11 = vor.u32 1.1754944e-38, %v612_v57  ;;  %vm611_vm7 = vcmp.eq.f32.partialorder %v610_v61, 8.507059e+37 }
  0x96   :  { %v512_v37 = vmul.f32 %v810_v35, %v510_v27  ;;  %v812_v42 = vpop.eup %811  ;;  %vm517_vm12 = vweird.f32 %v810_v35  ;;  %vm1438_vm15 = vmor %vm471_vm8, %vm472_vm10 }
  0x97   :  { %v468_v39 = vsub.f32 1.0, %v467_v20  ;;  %v814_v46 = vpop.eup %813  ;;  %v557_v47 = vmul.f32 %v812_v42, %v555_v29  ;;  %vm1444_vm1 = vmor %vm516_vm9, %vm517_vm12  ;;  %vm562_vm2 = vweird.f32 %v812_v42 }
  0x98   :  { %v513_v43 = vsub.f32 1.0, %v512_v37  ;;  %v602_v1 = vmul.f32 %v814_v46, %v600_v19  ;;  %vm607_vm3 = vweird.f32 %v814_v46  ;;  %vm1460_vm5 = vmor %vm561_vm14, %vm562_vm2 }
  0x99   :  { %v469_v0 = vmul.f32 %v808_v33, %v468_v39  ;;  %v558_v56 = vsub.f32 1.0, %v557_v47  ;;  %vm608_vm6 = vmor %vm606_vm0, %vm607_vm3 }
  0x9a   :  { %v514_v50 = vmul.f32 %v810_v35, %v513_v43  ;;  %v603_v60 = vsub.f32 1.0, %v602_v1 }
  0x9b   :  { %v470_v53 = vadd.f32 %v808_v33, %v469_v0  ;;  %v559_v62 = vmul.f32 %v812_v42, %v558_v56 }
  0x9c   :  { %v515_v58 = vadd.f32 %v810_v35, %v514_v50  ;;  %v604_v5 = vmul.f32 %v814_v46, %v603_v60 }
  0x9d   :  { %v474_v3 = vsel %vm1438_vm15, %v808_v33, %v470_v53  ;;  %v560_v8 = vadd.f32 %v812_v42, %v559_v62 }
  0x9e   :  { %v479_v54 = vsel %vm1424_vm11, %v478_v41, %v474_v3  ;;  %v519_v4 = vsel %vm1444_vm1, %v810_v35, %v515_v58  ;;  %v605_v10 = vadd.f32 %v814_v46, %v604_v5 }
  0x9f   :  { %v524_v7 = vsel %vm1428_vm13, %v523_v45, %v519_v4  ;;  %v618_v9 = vmul.f32 %v617_v36, %v479_v54  ;;  %v564_v14 = vsel %vm1460_vm5, %v812_v42, %v560_v8 }
  0xa0   :  { %v624_v12 = vmul.f32 %v623_v2, %v524_v7  ;;  %v569_v15 = vsel %vm1450_vm4, %v568_v30, %v564_v14  ;;  %v609_v17 = vsel %vm608_vm6, %v814_v46, %v605_v10 }
  0xa1   :  { %v621_v52 = vadd.f32 %v620_v38, %v618_v9  ;;  %v614_v16 = vsel %vm611_vm7, %v613_v11, %v609_v17  ;;  %v628_v22 = vmul.f32 %v627_v13, %v569_v15 }
  0xa2   :  { %v632_v23 = vmul.f32 %v631_v59, %v614_v16 }
  0xa3   :  { %v625_v18 = vadd.f32 %v624_v12, %v621_v52 }
  0xa5   :  { %v629_v24 = vadd.f32 %v628_v22, %v625_v18 }
  0xa7   :  { %v633_v25 = vadd.f32 %v632_v23, %v629_v24 }
  0xa9   :  { %v765_v21 = vmul.f32 -1.442695, %v633_v25 }
  0xab   :  { %815 = vpow2.f32 %v765_v21 }
  0xb1   :  { %v816_v27 = vpop.eup %815 }
  0xb2   :  { %v637_v28 = vadd.f32 1.0, %v816_v27 }
  0xb4   :  { %817 = vrcp.f32 %v637_v28  ;;  %v649_v32 = vand.u32 2147483648, %v637_v28  ;;  %vm643_vm8 = vweird.f32 %v637_v28  ;;  %v647_v33 = vand.u32 2147483647, %v637_v28 }
  0xb6   :  { %v650_v26 = vor.u32 1.1754944e-38, %v649_v32  ;;  %vm648_vm11 = vcmp.eq.f32.partialorder %v647_v33, 8.507059e+37 }
  0xba   :  { %v818_v29 = vpop.eup %817 }
  0xbb   :  { %v639_v19 = vmul.f32 %v818_v29, %v637_v28  ;;  %vm644_vm9 = vweird.f32 %v818_v29 }
  0xbc   :  { %vm645_vm10 = vmor %vm643_vm8, %vm644_vm9 }
  0xbd   :  { %v640_v31 = vsub.f32 1.0, %v639_v19 }
  0xbf   :  { %v641_v34 = vmul.f32 %v818_v29, %v640_v31 }
  0xc1   :  { %v642_v35 = vadd.f32 %v818_v29, %v641_v34 }
  0xc3   :  { %v646_v20 = vsel %vm645_vm10, %v818_v29, %v642_v35 }
  0xc4   :  { %v651_v36 = vsel %vm648_vm11, %v650_v26, %v646_v20 }
  0xc5   :  { %653 = vst [vmem:[#allocation14] sm:$0xff] %v651_v36 }
  0xc6   :  { %664 = dma.vmem_to_hbm [thread:$0]  %s660_s3, 128, %s662_s5, [#allocation5]  }
  0xc7   :  { %935 = dma.done.wait [#allocation5], 128  }
  0xc8   :  { %936 = vsyncadd [#allocation5], 4294967168 }
  0xc9   :  { %669 = vsyncpa [#allocation4], 1 }
  0xca   :  { %670 = vsyncpa [#allocation5], 1 }
  0xcb   :  { %671 = vsyncpa [#allocation6], 1 }
  0xcc   :  { %672 = vsyncpa [#allocation9], 1 }
  0xcd   :  { %673 = vsyncpa [#allocation12], 1 }

</bundles_post_ra>
